<compile_context>
chip_gen: v7x
topology: tpu7x:2x2x1
jax: 0.10.0
libtpu: 0.0.40
codegen_flags: <defaults>
</compile_context>

<pallas_src>
import functools
import math

import jax
import jax.numpy as jnp
from jax.experimental import pallas as pl
from jax.experimental.pallas import tpu as pltpu

EPS = 1e-6
_MIB = 1024 * 1024


def _round_up(x: int, m: int) -> int:
    return ((x + m - 1) // m) * m


def _sublane_multiple(dtype) -> int:
    # f32 -> 8 sublanes, bf16 -> 16, int8/fp8 -> 32 (packed rows travel in groups).
    return max(8, 32 // max(1, jnp.dtype(dtype).itemsize))


@functools.lru_cache(maxsize=None)
def _chip_budgets():
    """Returns (block_budget_bytes, vmem_limit_bytes, min_grid_steps)."""
    try:
        cap = int(pltpu.get_tpu_info().vmem_capacity_bytes)
    except Exception:
        cap = 64 * _MIB  # conservative fallback: assume the smallest (v7x-sized) VMEM
    if cap >= 96 * _MIB:
        # v5e / v6e: 128 MiB VMEM, 1 TensorCore -> biggest blocks, fewest grid steps.
        return 56 * _MIB, 96 * _MIB, 1
    # v7x-class: 64 MiB VMEM per TensorCore, 2 TensorCores share the "parallel"
    # grid axis -> keep total pipelined footprint well under 64 MiB and make sure
    # there are at least ~4 grid steps so neither core idles.
    return 40 * _MIB, 52 * _MIB, 4


def _pick_tile_rows(rows: int, width: int, dtype) -> int:
    """Largest row tile whose pipelined footprint fits the per-chip VMEM budget."""
    budget, _, min_steps = _chip_budgets()
    sub = _sublane_multiple(dtype)
    itemsize = jnp.dtype(dtype).itemsize
    # 2x double-buffered (input + output) blocks at their TRUE itemsize, plus
    # roughly two single-buffered f32 temporaries live inside the kernel body.
    bytes_per_row = width * (4 * itemsize + 2 * 4)
    tile = max(sub, budget // max(1, bytes_per_row))
    tile = min(tile, _round_up(rows, sub))
    if min_steps > 1:
        # Megacore sharding (v7x): guarantee >= min_steps grid steps when rows allow.
        tile = min(tile, max(sub, _round_up(-(-rows // min_steps), sub)))
    return max(sub, (tile // sub) * sub)


def _rmsnorm_kernel(x_ref, w_ref, o_ref):
    # x_ref: (TILE, H), w_ref: (1, H) (constant-index block, resident across grid),
    # o_ref: (TILE, H).  Per-row reduction over the last axis; HBM-bound, so the
    # XLU reduce / VPU elementwise work is free filler under the DMA stream.
    x = x_ref[...].astype(jnp.float32)
    w = w_ref[...].astype(jnp.float32)
    ms = jnp.mean(x * x, axis=-1, keepdims=True)
    rms = jnp.sqrt(ms) + EPS                    # eps OUTSIDE sqrt (matches torch module)
    inv = pl.reciprocal(rms, approx=False)      # exact: keep 1e-5 parity with reference
    o_ref[...] = (x * inv * w).astype(o_ref.dtype)


def rmsnorm(a: jax.Array, param: jax.Array, normalized_shape: tuple) -> jax.Array:
    """RMSNorm over the trailing `normalized_shape` dims of `a` (PyTorch semantics)."""
    norm_ndim = len(normalized_shape)
    assert a.shape[-norm_ndim:] == tuple(normalized_shape)

    hidden = math.prod(normalized_shape)
    rows = math.prod(a.shape[:-norm_ndim]) if a.ndim > norm_ndim else 1

    # Collapsing only the LEADING dims keeps the minor dim unchanged -> no HBM relayout.
    # (For multi-dim normalized_shape the trailing dims are merged; param is tiny.)
    x2d = a.reshape(rows, hidden)
    w2d = param.reshape(1, hidden)

    _, vmem_limit, _ = _chip_budgets()
    tile_rows = _pick_tile_rows(rows, hidden, a.dtype)
    grid = (pl.cdiv(rows, tile_rows),)          # ragged last block handled by Pallas

    out2d = pl.pallas_call(
        _rmsnorm_kernel,
        out_shape=jax.ShapeDtypeStruct((rows, hidden), a.dtype),
        grid_spec=pltpu.PrefetchScalarGridSpec(
            num_scalar_prefetch=0,
            grid=grid,
            in_specs=[
                pl.BlockSpec((tile_rows, hidden), lambda i: (i, 0)),
                # Constant-index weight block: fetched once, resident across the grid.
                pl.BlockSpec((1, hidden), lambda i: (0, 0)),
            ],
            out_specs=pl.BlockSpec((tile_rows, hidden), lambda i: (i, 0)),
        ),
        compiler_params=pltpu.CompilerParams(
            dimension_semantics=("parallel",),
            vmem_limit_bytes=vmem_limit,
        ),
    )(x2d, w2d)

    return out2d.reshape(a.shape)


def rmsnorm_ref(a, param, normalized_shape):
    """Pure-JAX reference matching the PyTorch module exactly."""
    dims = tuple(-(i + 1) for i in range(len(normalized_shape)))
    rms = jnp.sqrt(jnp.mean(a * a, axis=dims, keepdims=True)) + EPS
    return param * a * 1.0 / rms


if __name__ == "__main__":
    key = jax.random.PRNGKey(0)
    k1, k2 = jax.random.split(key)

    # Case 1: module's toy shape (batch=2, seq=8, hidden=32).
    normalized_shape = (32,)
    a = jax.random.normal(k1, (2, 8, 32), dtype=jnp.float32)
    param = jnp.ones(normalized_shape, dtype=jnp.float32)  # nn.Parameter(torch.ones(...))
    out = jax.block_until_ready(rmsnorm(a, param, normalized_shape))
    ref = rmsnorm_ref(a, param, normalized_shape)
    assert out.shape == a.shape and out.dtype == a.dtype
    assert jnp.allclose(out, ref, atol=1e-5, rtol=1e-5), "mismatch vs reference (small-H)"

    # Case 2: hidden >= 128 with a non-divisible row count (3*7 = 21 rows) ->
    # exercises the cdiv grid with a masked ragged last block (no pad/slice).
    normalized_shape2 = (256,)
    a2 = jax.random.normal(k2, (3, 7, 256), dtype=jnp.float32)
    param2 = jnp.ones(normalized_shape2, dtype=jnp.float32)
    out2 = jax.block_until_ready(rmsnorm(a2, param2, normalized_shape2))
    ref2 = rmsnorm_ref(a2, param2, normalized_shape2)
    assert out2.shape == a2.shape and out2.dtype == a2.dtype
    assert jnp.allclose(out2, ref2, atol=1e-5, rtol=1e-5), "mismatch vs reference (ragged rows)"

    print("KERNEL_OK")
</pallas_src>

<mosaic_0001>
module attributes {stable_mosaic.version = 11 : i64} {
  func.func @_rmsnorm_kernel(%arg0: i32, %arg1: memref<8x32xf32, #tpu.memory_space<vmem>>, %arg2: memref<1x32xf32, #tpu.memory_space<vmem>>, %arg3: memref<8x32xf32, #tpu.memory_space<vmem>>) attributes {dimension_semantics = [#tpu.dimension_semantics<parallel>], iteration_bounds = array<i64: 2>, scalar_prefetch = 0 : i64, scratch_operands = 0 : i64, tpu.core_type = #tpu.core_type<tc>, window_params = [{transform_indices = @transform_0, window_bounds = array<i64: 8, 32>}, {pipeline_mode = #tpu.pipeline_mode<synchronous>, transform_indices = @transform_1, window_bounds = array<i64: 1, 32>}, {transform_indices = @transform_2, window_bounds = array<i64: 8, 32>}]} {
    %c0 = arith.constant 0 : index
    %c0_0 = arith.constant 0 : index
    %0 = vector.load %arg1[%c0, %c0_0] : memref<8x32xf32, #tpu.memory_space<vmem>>, vector<8x32xf32>
    %c0_1 = arith.constant 0 : index
    %c0_2 = arith.constant 0 : index
    %1 = vector.load %arg2[%c0_1, %c0_2] : memref<1x32xf32, #tpu.memory_space<vmem>>, vector<1x32xf32>
    %2 = arith.mulf %0, %0 : vector<8x32xf32>
    %cst = arith.constant dense<0.000000e+00> : vector<8xf32>
    %3 = vector.multi_reduction <add>, %2, %cst [1] : vector<8x32xf32> to vector<8xf32>
    %4 = vector.shape_cast %3 : vector<8xf32> to vector<8x1xf32>
    %cst_3 = arith.constant 3.200000e+01 : f32
    %5 = vector.broadcast %cst_3 : f32 to vector<8x1xf32>
    %6 = arith.divf %4, %5 : vector<8x1xf32>
    %7 = math.sqrt %6 : vector<8x1xf32>
    %cst_4 = arith.constant 9.99999997E-7 : f32
    %8 = vector.broadcast %cst_4 : f32 to vector<8x1xf32>
    %9 = arith.addf %7, %8 : vector<8x1xf32>
    %10 = tpu.reciprocal %9 : vector<8x1xf32> -> vector<8x1xf32>
    %11 = vector.broadcast %10 : vector<8x1xf32> to vector<8x32xf32>
    %12 = arith.mulf %0, %11 : vector<8x32xf32>
    %13 = vector.broadcast %1 : vector<1x32xf32> to vector<8x32xf32>
    %14 = arith.mulf %12, %13 : vector<8x32xf32>
    %c0_5 = arith.constant 0 : index
    %c0_6 = arith.constant 0 : index
    %15 = vector.load %arg3[%c0_5, %c0_6] : memref<8x32xf32, #tpu.memory_space<vmem>>, vector<8x32xf32>
    tpu.vector_store %arg3[%c0_5, %c0_6], %14 {strides = array<i32>} : memref<8x32xf32, #tpu.memory_space<vmem>>, vector<8x32xf32>,
    return
  }
  func.func @transform_0(%arg0: i32) -> (i32, i32) {
    %c0_i32 = arith.constant 0 : i32
    %c0_i32_0 = arith.constant 0 : i32
    return %arg0, %c0_i32 : i32, i32
  }
  func.func @transform_1(%arg0: i32) -> (i32, i32) {
    %c0_i32 = arith.constant 0 : i32
    %c0_i32_0 = arith.constant 0 : i32
    %c0_i32_1 = arith.constant 0 : i32
    return %c0_i32, %c0_i32_0 : i32, i32
  }
  func.func @transform_2(%arg0: i32) -> (i32, i32) {
    %c0_i32 = arith.constant 0 : i32
    %c0_i32_0 = arith.constant 0 : i32
    return %arg0, %c0_i32 : i32, i32
  }
}

</mosaic_0001>

<bundles_post_ra>
// kernel: tpu_custom_call.1
= control target key start
LH: loop header
LB: loop body
LE: loop exit
PB: predicated region body
PF: predicated region fallthrough
CT: control target
= control target key end

     0   :  { %7 = vsyncpa [#allocation3], 0  ;;  %s614_s0 = inlined_call_operand.hbm [shape: f32[16,32], index: 0, kind: input, shape index: {}]   ;;  %s615_s1 = inlined_call_operand.vmem [shape: f32[1,32], index: 1, kind: input, shape index: {}]   ;;  %s616_s2 = inlined_call_operand.hbm [shape: f32[16,32], index: 2, kind: output, shape index: {}]  }
   0x1   :  { %9 = vsyncpa [#allocation3 + $0x1], 0 }
   0x2   :  { %10 = vsyncpa [#allocation4], 0 }
   0x3   :  { %12 = vsyncpa [#allocation4 + $0x1], 0  ;;  %s448_s9 = smov 0   ;;  %s450_s10 = smov 0  }
   0x4   :  { %s452_s11 = smov 0   ;;  %s454_s12 = smov 0  }
   0x5 LB: > { %s469_s13 = sadd.s32 4294967295, %s429_s12   ;;  %s270_s14 = sadd.s32 4294967294, %s429_s12   ;;  %s429_s12 = sphi %s454_s12, %s631_s12   ;;  %s425_s11 = sphi %s452_s11, %s630_s11   ;;  %s421_s10 = sphi %s450_s10, %s629_s10   ;;  %s417_s9 = sphi %s448_s9, %s628_s9  }
   0x6   : > { %s473_s15 = sadd.s32 1, %s429_s12   ;;  %s25_s16 = sadd.s32 1, %s425_s11 }
   0x7   : > { %s22_s17 = ssub.s32 %s429_s12, %s473_s15  ;;  %p32_p0 = scmp.ne.s32.totalorder %s425_s11, %s421_s10 }
   0x8   : > { %p23_p1 = scmp.eq.s32.totalorder %s22_s17, 0  ;;  %p33_p2 = scmp.eq.s32.totalorder %s429_s12, 0 }
   0x9   : > { %p38_p3 = scmp.ne.s32.totalorder %s421_s10, %s417_s9  ;;  %p39_p4 = scmp.eq.s32.totalorder %s469_s13, 0 }
   0xa   : > { %s485_s18 = scalar_select %p23_p1, %s425_s11, %s25_s16  }
   0xb   : > { %p487_p5 = por %p33_p2, %p32_p0  ;;  %p491_p6 = por %p39_p4, %p38_p3 }
   0xc   : > { %p83_p7 = scmp.eq.s32.totalorder %s469_s13, 1  ;;  %p89_p8 = scmp.eq.s32.totalorder %s270_s14, 1 }
   0xd   : > { %p295_p10 = scmp.lt.s32.totalorder %s429_s12, 2  ;;  %s112_s23 = sand.u32 1, %s425_s11  }
   0xe   : > { %p498_p11 = por %p83_p7, %p32_p0  ;;  %p502_p12 = por %p89_p8, %p38_p3 }
   0xf   : > { %s274_s24 = sshll.u32 %s429_s12, 7  ;;  %s273_s25 = sshll.u32 %s112_s23, 3 }
  0x10   : > { %s620_s21 = scalar_select %p498_p11, 1, 0 }
  0x11   : > { %s621_s22 = scalar_select %p502_p12, 1, 0 }
  0x12   : > { %s511_s28 = scalar_lea.hbm %s614_s0, %s274_s24  ;;  %s116_s29 = scalar_lea.vmem [#allocation2], %s273_s25 }
  0x13   : > { %s123_s30 = sshll.u32 %s116_s29, 4  ;;  %p515_p13 = pnand %p295_p10, %p487_p5  ;;  %s519_s30 = int_to_ptr.vmem [resolvable:$true] %s123_s30 }
  0x14   : > { %s113_s4 = scalar_lea.sflag [#allocation3], %s112_s23  ;;  %s333_s5 = scalar_lea.hbm %s511_s28, 128 }
  0x15   : > { %p334_p2 = scmp.ne.s32.totalorder %s511_s28, %s333_s5  ;;  %p335_p3 = pneg %p515_p13 }
  0x16   : > { %s338_s8 = scalar_lea.hbm %s614_s0, 256  ;;  %p339_p5 = scmp.lt.u32.totalorder %s511_s28, %s614_s0 }
  0x17   : > { %p336_p4 = pnand %p335_p3, %p334_p2  ;;  %p340_p8 = scmp.lt.u32.totalorder %s338_s8, %s333_s5 }
  0x18   : > { %p342_p9 = scmp.lt.u32.totalorder %s333_s5, %s511_s28 }
  0x19   : > { %p337_p7 = pneg %p336_p4  ;;  %p341_p10 = por %p340_p8, %p339_p5 }
  0x1b   : > { %p343_p0 = por %p342_p9, %p341_p10 }
  0x1d   : > { %p344_p1 = pnand %p343_p0, %p337_p7 }
  0x1f   : > { %347 = shalt.err (!%p344_p1)
}
  0x20   : > { %s348_s17 = scalar_lea.vmem %s519_s30, 128  ;;  %s431_s19 = smov [#allocation2]  }
  0x21   : > { %p349_p2 = scmp.ne.s32.totalorder %s519_s30, %s348_s17  ;;  %s353_s23 = sshll.u32 %s431_s19, 4  ;;  %s354_s23 = int_to_ptr.vmem [resolvable:$false] %s353_s23 }
  0x22   : > { %s355_s24 = scalar_lea.vmem %s354_s23, 256  ;;  %p356_p11 = scmp.lt.s32.totalorder %s519_s30, %s354_s23 }
  0x23   : > { %p351_p4 = pnand %p349_p2, %p335_p3  ;;  %p357_p5 = scmp.lt.s32.totalorder %s355_s24, %s348_s17 }
  0x25   : > { %p352_p12 = pneg %p351_p4  ;;  %p358_p8 = por %p357_p5, %p356_p11 }
  0x27   : > { %p359_p9 = pnand %p358_p8, %p352_p12 }
  0x29   : > { %362 = shalt.err (!%p359_p9)
}
  0x2a   : > { %290 = dma.hbm_to_vmem [thread:$0]  (!%p515_p13), %s511_s28, 128, %s519_s30, %s113_s4  }
  0x2b   : > { %p623_p0 = scmp.lt.s32.totalorder %s429_s12, 3  ;;  %p624_p1 = scmp.ge.s32.totalorder %s429_s12, 1 }
  0x2d   : > { %p129_p3 = pnand %p624_p1, %p623_p0 }
  0x2e   : > { %s553_s25 = sand.u32 (!%p129_p3), 1, %s421_s10  }
  0x2f   : > { %132 = sbr.rel (%p129_p3) target bundleno = 249 (0xf9), region = 28  ;;  %s276_s26 = sshll.u32 (!%p129_p3), %s553_s25, 3 }
  0x30   : > { %s135_s27 = scalar_lea.sflag (!%p129_p3), [#allocation3], %s553_s25  ;;  %s138_s29 = scalar_lea.vmem (!%p129_p3), [#allocation2], %s276_s26 }
  0x36   : > { %408 = dma.done.wait (%p491_p6), %s135_s27, 128  }
  0x37   : > { %410 = vsyncadd (%p491_p6), %s135_s27, 4294967168  ;;  %v159_v0 = vld [vmem:[%s138_s29] sm:$0xff]  ;;  %vm162_vm0 = vcmask 261120   ;;  %s280_s30 = sshll.u32 %s469_s13, 7  ;;  %s158_s3 = scalar_lea.vmem [#allocation5], %s276_s26 }
  0x38   : > { %v161_v1 = vmul.f32 %v159_v0, %v159_v0  ;;  %v278_v12 = vld [vmem:[%s615_s1] ss:$0 sm:$0xff]  ;;  %s200_s4 = sshll.u32 %s158_s3, 4  ;;  %s569_s7 = scalar_lea.hbm %s616_s2, %s280_s30  ;;  %s571_s4 = int_to_ptr.vmem [resolvable:$true] %s200_s4 }
  0x39   : > { %s187_s8 = scalar_lea.sflag [#allocation4], %s553_s25  ;;  %s363_s14 = scalar_lea.vmem %s571_s4, 128 }
  0x3a   : > { %v163_v2 = vsel %vm162_vm0, %v161_v1, 0.0  ;;  %p364_p6 = scmp.ne.s32.totalorder %s571_s4, %s363_s14  ;;  %p625_p11 = scmp.ne.s32.totalorder %s620_s21, 0 }
  0x3b   : > { %164 = vadd.xlane.f32.xlu0 %v163_v2  ;;  %s432_s13 = smov [#allocation5]  }
  0x3c   : > { %p365_p12 = pnand %p364_p6, %p625_p11  ;;  %s367_s16 = sshll.u32 %s432_s13, 4  ;;  %s368_s16 = int_to_ptr.vmem [resolvable:$false] %s367_s16 }
  0x3d   : > { %s369_s17 = scalar_lea.vmem %s368_s16, 256  ;;  %p370_p7 = scmp.lt.s32.totalorder %s571_s4, %s368_s16 }
  0x3e   : > { %p366_p13 = pneg %p365_p12  ;;  %p371_p10 = scmp.lt.s32.totalorder %s369_s17, %s363_s14 }
  0x40   : > { %p372_p2 = por %p371_p10, %p370_p7 }
  0x42   : > { %p373_p4 = pnand %p372_p2, %p366_p13 }
  0xc8   : > { %v165_v3 = vpop.xlane.xlu0 %164 }
  0xc9   : > { %v167_v4 = vmul.f32 0.03125, %v165_v3 }
  0xcb   : > { %329 = vrsqrt.f32 %v167_v4  ;;  %vm170_vm1 = vcmp.eq.f32.partialorder %v167_v4, inf  ;;  %v173_v7 = vand.u32 2147483648, %v167_v4  ;;  %vm172_vm2 = vcmp.eq.f32.partialorder %v167_v4, 0.0 }
  0xd5   : > { %v330_v5 = vpop.eup %329 }
  0xd6   : > { %v169_v6 = vmul.f32 %v330_v5, %v167_v4 }
  0xd8   : > { %v171_v8 = vsel %vm170_vm1, %v167_v4, %v169_v6 }
  0xd9   : > { %v174_v9 = vsel %vm172_vm2, %v173_v7, %v171_v8 }
  0xda   : > { %v175_v10 = vadd.f32 1e-06, %v174_v9 }
  0xdc   : > { %331 = vrcp.f32 %v175_v10 }
  0xe6   : > { %v332_v11 = vpop.eup %331 }
  0xe7   : > { %v177_v13 = vmul.f32 %v332_v11, %v159_v0 }
  0xe9   : > { %v184_v14 = vmul.f32 %v278_v12, %v177_v13 }
  0xeb   : > { %185 = vst.msk [vmem:[%s158_s3] sm:$0xff] %vm162_vm0, %v184_v14 }
  0xec   : > { %376 = shalt.err (!%p373_p4)
}
  0xed   : > { %s377_s19 = scalar_lea.hbm %s569_s7, 128  ;;  %s381_s25 = scalar_lea.hbm %s616_s2, 256 }
  0xee   : > { %p378_p5 = scmp.ne.s32.totalorder %s569_s7, %s377_s19  ;;  %p382_p0 = scmp.lt.u32.totalorder %s569_s7, %s616_s2 }
  0xef   : > { %p383_p1 = scmp.lt.u32.totalorder %s381_s25, %s377_s19  ;;  %p385_p6 = scmp.lt.u32.totalorder %s377_s19, %s569_s7 }
  0xf0   : > { %p379_p8 = pnand %p378_p5, %p625_p11 }
  0xf1   : > { %p384_p3 = por %p383_p1, %p382_p0 }
  0xf2   : > { %p380_p9 = pneg %p379_p8 }
  0xf3   : > { %p386_p12 = por %p385_p6, %p384_p3 }
  0xf5   : > { %p387_p13 = pnand %p386_p12, %p380_p9 }
  0xf7   : > { %390 = shalt.err (!%p387_p13)
}
  0xf8   : > { %285 = dma.vmem_to_hbm [thread:$0]  (%p625_p11), %s571_s4, 128, %s569_s7, %s187_s8  }
  0xf9 PF: > { %s212_s29 = sand.u32 1, %s417_s9   ;;  %p626_p7 = scmp.ne.s32.totalorder %s621_s22, 0 }
  0xfa   : > { %p627_p10 = scmp.ge.s32.totalorder %s429_s12, 2  ;;  %s213_s20 = scalar_lea.sflag [#allocation4], %s212_s29 }
  0xfc   : > { %p292_p2 = pnand %p627_p10, %p626_p7 }
  0xfe   : > { %412 = dma.done.wait (!%p292_p2), %s213_s20, 128  }
  0xff   : > { %414 = vsyncadd (!%p292_p2), %s213_s20, 4294967168  ;;  %p15_p4 = scmp.ge.s32.totalorder %s473_s15, 4   ;;  %s628_s9 = smov %s421_s10 }
 0x100   : > { %s629_s10 = smov %s425_s11  ;;  %s630_s11 = smov %s485_s18 }
 0x101   : > { %s631_s12 = smov %s473_s15  ;;  %17 = sbr.rel (!%p15_p4) target bundleno = 5 (0x5), region = 73 }
 0x108   :  { %218 = vsyncpa [#allocation3], 1 }
 0x109   :  { %220 = vsyncpa [#allocation3 + $0x1], 1 }
 0x10a   :  { %221 = vsyncpa [#allocation4], 1 }
 0x10b   :  { %223 = vsyncpa [#allocation4 + $0x1], 1 }

</bundles_post_ra>
